<compile_context>
chip_gen: v5e
topology: v5e:2x2
jax: 0.10.0
libtpu: 0.0.40
codegen_flags: <defaults>
</compile_context>

<pallas_src>
import functools

import jax
import jax.numpy as jnp
from jax.experimental import pallas as pl
from jax.experimental.pallas import tpu as pltpu


def _sublayer_connection_kernel(x_ref, a2_ref, b2_ref, w_ref, bias_ref,
                                o_ref, normed_ref, *, eps, feat, tn, nj,
                                row_chunk):
    # x_ref:      (tm, D)  input row tile (resident across the inner j axis)
    # a2/b2_ref:  (1, D)   LayerNorm scale / shift (f32)
    # w_ref:      (D, tn)  bf16 weight column tile (fully resident when nj == 1)
    # bias_ref:   (1, tn)  Linear bias column tile (f32)
    # o_ref:      (tm, tn) output tile
    # normed_ref: (tm, D)  bf16 scratch caching LayerNorm(x) for the current row tile
    j = pl.program_id(1)
    tm = normed_ref.shape[0]
    inv_nm1 = 1.0 / max(feat - 1, 1)   # torch.std: Bessel correction (ddof=1)

    # --- LayerNorm once per row tile, chunked so f32 temporaries stay bounded ---
    @pl.when(j == 0)
    def _():
        a2 = a2_ref[...]
        b2 = b2_ref[...]

        def ln_chunk(r0):
            x = x_ref[pl.ds(r0, row_chunk), :].astype(jnp.float32)
            mean = jnp.mean(x, axis=-1, keepdims=True)
            diff = x - mean
            var = jnp.sum(diff * diff, axis=-1, keepdims=True) * inv_nm1
            inv = pl.reciprocal(jnp.sqrt(var) + eps, approx=True)   # EUP slot
            normed = a2 * (diff * inv) + b2
            normed_ref[pl.ds(r0, row_chunk), :] = normed.astype(normed_ref.dtype)

        n_chunks = tm // row_chunk
        if n_chunks == 1:
            ln_chunk(0)
        else:
            @pl.loop(0, n_chunks)
            def _(c):
                ln_chunk(pl.multiple_of(c * row_chunk, row_chunk))

    # --- sublayer = Linear(D, D): bf16 operands, f32 accumulation on the MXU ---
    sub = jnp.dot(normed_ref[...], w_ref[...],
                  preferred_element_type=jnp.float32) + bias_ref[...]

    # --- residual add against the matching N-slice of the resident input tile ---
    if nj == 1:
        x_slice = x_ref[...]
    else:
        off = pl.multiple_of(j * tn, tn)
        x_slice = x_ref[:, pl.ds(off, tn)]
    o_ref[...] = (x_slice.astype(jnp.float32) + sub).astype(o_ref.dtype)


def _round_up(x, m):
    return ((x + m - 1) // m) * m


def _vmem_capacity_bytes():
    try:
        cap = getattr(pltpu.get_tpu_info(), "vmem_capacity_bytes", None)
        if cap:
            return int(cap)
    except Exception:
        pass
    return 64 * 1024 * 1024   # conservative default (v7x-sized)


def _select_tiles(rows, D, x_bytes, vmem_cap):
    """Pick (tm, tn, nj, deep_weight, needed_bytes)."""
    big_vmem = vmem_cap >= 96 * 1024 * 1024          # v5e / v6e: 128 MiB; v7x: 64 MiB

    # Weight residency: keep the whole bf16 weight in VMEM when it fits in ~VMEM/4
    # (leaves room for double-buffered activation tiles + scratch).
    if (D * D * 2) <= vmem_cap // 4 or D % 128 != 0:
        # TODO(synk): D above the residency threshold with D % 128 != 0 falls back to a
        # single full-width weight tile and may exceed VMEM for such (rare) shapes.
        tn = D
    elif D % 512 == 0:
        tn = 512
    elif D % 256 == 0:
        tn = 256
    else:
        tn = 128                                     # v5e fallback (4x128x128 MXU)
    nj = pl.cdiv(D, tn)
    deep_weight = (nj > 1) and big_vmem              # 3-deep weight pipeline if headroom

    if big_vmem:
        tm = 1024 if D <= 2048 else 512
    else:
        tm = 128 if D >= 8192 else 256
    # Keep >= 2 row tiles so the "parallel" axis can feed both TensorCores (v7x megacore).
    tm = min(tm, max(8, _round_up(pl.cdiv(rows, 2), 8)))

    w_bufs = 3 if deep_weight else 2

    def needed(tm_):
        return (2 * tm_ * D * x_bytes                # x row tiles (double-buffered)
                + 2 * tm_ * tn * x_bytes             # output tiles (double-buffered)
                + w_bufs * D * tn * 2                # bf16 weight tile(s)
                + tm_ * D * 2                        # bf16 normed scratch
                + 3 * min(tm_, 128) * D * 4          # f32 LayerNorm chunk temporaries
                + 6 * D * 4)                         # a_2 / b_2 / bias

    while tm > 8 and needed(tm) > 0.8 * vmem_cap:    # safety valve for huge D
        tm = max(8, _round_up(tm // 2, 8))

    return tm, tn, nj, deep_weight, needed(tm)


def sublayer_connection(x, a2, b2, w, bias, *, eps=1e-6):
    """y = x + Linear(LayerNorm(x)).

    x: [B, S, D]; a2, b2, bias: [D]; w: [D, D] (store persistently in bf16 to avoid a
    per-call HBM cast pass).
    """
    B, S, D = x.shape
    rows = B * S
    x_bytes = jnp.dtype(x.dtype).itemsize

    vmem_cap = _vmem_capacity_bytes()
    tm, tn, nj, deep_weight, needed = _select_tiles(rows, D, x_bytes, vmem_cap)

    # Row sub-chunk for the in-kernel LayerNorm (bounds f32 temporaries at large D).
    row_chunk = tm
    for c in (128, 64, 32, 16, 8):
        if tm % c == 0:
            row_chunk = c
            break

    # No jnp.pad: the grid uses cdiv and Pallas masks the partial last row tile.
    x2d = x.reshape(rows, D)
    a2_2d = a2.reshape(1, D).astype(jnp.float32)
    b2_2d = b2.reshape(1, D).astype(jnp.float32)
    bias_2d = bias.reshape(1, D).astype(jnp.float32)
    if w.dtype != jnp.bfloat16:                      # prefer callers store bf16 weights
        w = w.astype(jnp.bfloat16)

    kernel = functools.partial(_sublayer_connection_kernel, eps=eps, feat=D,
                               tn=tn, nj=nj, row_chunk=row_chunk)

    w_spec_kwargs = dict(pipeline_mode=pl.Buffered(3)) if deep_weight else {}
    vmem_limit = int(min(max(int(needed * 1.3), 32 * 1024 * 1024),
                         int(vmem_cap * 0.85)))

    out2d = pl.pallas_call(
        kernel,
        out_shape=jax.ShapeDtypeStruct((rows, D), x.dtype),
        grid_spec=pltpu.PrefetchScalarGridSpec(
            num_scalar_prefetch=0,
            grid=(pl.cdiv(rows, tm), nj),
            in_specs=[
                pl.BlockSpec((tm, D), lambda i, j: (i, 0)),    # x row tile (full width)
                pl.BlockSpec((1, D), lambda i, j: (0, 0)),     # a_2
                pl.BlockSpec((1, D), lambda i, j: (0, 0)),     # b_2
                pl.BlockSpec((D, tn), lambda i, j: (0, j),     # bf16 weight tile
                             **w_spec_kwargs),
                pl.BlockSpec((1, tn), lambda i, j: (0, j)),    # bias tile
            ],
            out_specs=pl.BlockSpec((tm, tn), lambda i, j: (i, j)),
            scratch_shapes=[pltpu.VMEM((tm, D), jnp.bfloat16)],
        ),
        compiler_params=pltpu.CompilerParams(
            # j carries the cached LayerNorm scratch -> must stay "arbitrary".
            dimension_semantics=("parallel", "arbitrary"),
            vmem_limit_bytes=vmem_limit,
        ),
    )(x2d, a2_2d, b2_2d, w, bias_2d)

    return out2d.reshape(B, S, D)


def _reference(x, a2, b2, w, bias, eps=1e-6):
    # Matches the kernel's dtype flow: f32 LayerNorm, bf16 matmul operands, f32 accumulate.
    xf = x.astype(jnp.float32)
    mean = jnp.mean(xf, axis=-1, keepdims=True)
    diff = xf - mean
    D = x.shape[-1]
    std = jnp.sqrt(jnp.sum(diff * diff, axis=-1, keepdims=True) / (D - 1))
    normed = a2 * diff / (std + eps) + b2
    sub = jnp.dot(normed.reshape(-1, D).astype(jnp.bfloat16),
                  w.astype(jnp.bfloat16),
                  preferred_element_type=jnp.float32).reshape(x.shape) + bias
    return (xf + sub).astype(x.dtype)


if __name__ == "__main__":
    B, S, D = 2, 8, 32
    key = jax.random.PRNGKey(0)
    kx, kw, kb = jax.random.split(key, 3)

    x = jax.random.normal(kx, (B, S, D), dtype=jnp.float32)

    # LayerNorm params per nn.Parameter(torch.ones/zeros(features))
    a2 = jnp.ones((D,), dtype=jnp.float32)
    b2 = jnp.zeros((D,), dtype=jnp.float32)

    # TODO(synk): the original module accepts an arbitrary `sublayer` callable;
    # it is instantiated here as a deterministic Linear(D -> D).
    # Weight stored persistently in bf16 (no per-call cast pass in the wrapper).
    w = (jax.random.normal(kw, (D, D), dtype=jnp.float32) * 0.05).astype(jnp.bfloat16)
    bias = jax.random.normal(kb, (D,), dtype=jnp.float32) * 0.01

    out = jax.block_until_ready(sublayer_connection(x, a2, b2, w, bias))
    ref = _reference(x, a2, b2, w, bias)

    assert out.shape == (B, S, D)
    assert jnp.allclose(out, ref, atol=5e-3, rtol=5e-3), float(jnp.max(jnp.abs(out - ref)))

    print("KERNEL_OK")
</pallas_src>

<mosaic_0001>
module attributes {stable_mosaic.version = 11 : i64} {
  func.func @_sublayer_connection_kernel(%arg0: i32, %arg1: i32, %arg2: memref<8x32xf32, #tpu.memory_space<vmem>>, %arg3: memref<1x32xf32, #tpu.memory_space<vmem>>, %arg4: memref<1x32xf32, #tpu.memory_space<vmem>>, %arg5: memref<32x32xbf16, #tpu.memory_space<vmem>>, %arg6: memref<1x32xf32, #tpu.memory_space<vmem>>, %arg7: memref<8x32xf32, #tpu.memory_space<vmem>>, %arg8: memref<8x32xbf16, #tpu.memory_space<vmem>>) attributes {dimension_semantics = [#tpu.dimension_semantics<parallel>, #tpu.dimension_semantics<arbitrary>], iteration_bounds = array<i64: 2, 1>, scalar_prefetch = 0 : i64, scratch_operands = 1 : i64, tpu.core_type = #tpu.core_type<tc>, window_params = [{transform_indices = @transform_0, window_bounds = array<i64: 8, 32>}, {pipeline_mode = #tpu.pipeline_mode<synchronous>, transform_indices = @transform_1, window_bounds = array<i64: 1, 32>}, {pipeline_mode = #tpu.pipeline_mode<synchronous>, transform_indices = @transform_2, window_bounds = array<i64: 1, 32>}, {transform_indices = @transform_3, window_bounds = array<i64: 32, 32>}, {transform_indices = @transform_4, window_bounds = array<i64: 1, 32>}, {transform_indices = @transform_5, window_bounds = array<i64: 8, 32>}]} {
    %c0_i32 = arith.constant 0 : i32
    %0 = arith.cmpi eq, %arg1, %c0_i32 : i32
    %1 = arith.extui %0 : i1 to i32
    %c0_i32_0 = arith.constant 0 : i32
    %2 = arith.cmpi ne, %1, %c0_i32_0 : i32
    scf.if %2 {
      %c0_10 = arith.constant 0 : index
      %c0_11 = arith.constant 0 : index
      %12 = vector.load %arg3[%c0_10, %c0_11] : memref<1x32xf32, #tpu.memory_space<vmem>>, vector<1x32xf32>
      %c0_12 = arith.constant 0 : index
      %c0_13 = arith.constant 0 : index
      %13 = vector.load %arg4[%c0_12, %c0_13] : memref<1x32xf32, #tpu.memory_space<vmem>>, vector<1x32xf32>
      %c0_14 = arith.constant 0 : index
      %c0_15 = arith.constant 0 : index
      %14 = vector.load %arg2[%c0_14, %c0_15] : memref<8x32xf32, #tpu.memory_space<vmem>>, vector<8x32xf32>
      %cst_16 = arith.constant dense<0.000000e+00> : vector<8xf32>
      %15 = vector.multi_reduction <add>, %14, %cst_16 [1] : vector<8x32xf32> to vector<8xf32>
      %16 = vector.shape_cast %15 : vector<8xf32> to vector<8x1xf32>
      %cst_17 = arith.constant 3.200000e+01 : f32
      %17 = vector.broadcast %cst_17 : f32 to vector<8x1xf32>
      %18 = arith.divf %16, %17 : vector<8x1xf32>
      %19 = vector.broadcast %18 : vector<8x1xf32> to vector<8x32xf32>
      %20 = arith.subf %14, %19 : vector<8x32xf32>
      %21 = arith.mulf %20, %20 : vector<8x32xf32>
      %cst_18 = arith.constant dense<0.000000e+00> : vector<8xf32>
      %22 = vector.multi_reduction <add>, %21, %cst_18 [1] : vector<8x32xf32> to vector<8xf32>
      %23 = vector.shape_cast %22 : vector<8xf32> to vector<8x1xf32>
      %cst_19 = arith.constant 0.0322580636 : f32
      %24 = vector.broadcast %cst_19 : f32 to vector<8x1xf32>
      %25 = arith.mulf %23, %24 : vector<8x1xf32>
      %26 = math.sqrt %25 : vector<8x1xf32>
      %cst_20 = arith.constant 9.99999997E-7 : f32
      %27 = vector.broadcast %cst_20 : f32 to vector<8x1xf32>
      %28 = arith.addf %26, %27 : vector<8x1xf32>
      %29 = tpu.reciprocal %28 {approx = true} : vector<8x1xf32> -> vector<8x1xf32>
      %30 = vector.broadcast %29 : vector<8x1xf32> to vector<8x32xf32>
      %31 = arith.mulf %20, %30 : vector<8x32xf32>
      %32 = vector.broadcast %12 : vector<1x32xf32> to vector<8x32xf32>
      %33 = arith.mulf %32, %31 : vector<8x32xf32>
      %34 = vector.broadcast %13 : vector<1x32xf32> to vector<8x32xf32>
      %35 = arith.addf %33, %34 : vector<8x32xf32>
      %36 = arith.truncf %35 : vector<8x32xf32> to vector<8x32xbf16>
      %c0_21 = arith.constant 0 : index
      %c0_22 = arith.constant 0 : index
      %37 = vector.load %arg8[%c0_21, %c0_22] : memref<8x32xbf16, #tpu.memory_space<vmem>>, vector<8x32xbf16>
      tpu.vector_store %arg8[%c0_21, %c0_22], %36 {strides = array<i32>} : memref<8x32xbf16, #tpu.memory_space<vmem>>, vector<8x32xbf16>,
    } else {
    }
    %c0 = arith.constant 0 : index
    %c0_1 = arith.constant 0 : index
    %3 = vector.load %arg8[%c0, %c0_1] : memref<8x32xbf16, #tpu.memory_space<vmem>>, vector<8x32xbf16>
    %c0_2 = arith.constant 0 : index
    %c0_3 = arith.constant 0 : index
    %4 = vector.load %arg5[%c0_2, %c0_3] : memref<32x32xbf16, #tpu.memory_space<vmem>>, vector<32x32xbf16>
    %cst = arith.constant dense<0.000000e+00> : vector<8x32xf32>
    %5 = tpu.matmul %3, %4, %cst {dimension_numbers = #tpu.dot_dimension_numbers<[1], [0], [0], [1], [0, 0, 1, 1], [], []>} : vector<8x32xbf16>, vector<32x32xbf16>, vector<8x32xf32> -> vector<8x32xf32>
    %c0_4 = arith.constant 0 : index
    %c0_5 = arith.constant 0 : index
    %6 = vector.load %arg6[%c0_4, %c0_5] : memref<1x32xf32, #tpu.memory_space<vmem>>, vector<1x32xf32>
    %7 = vector.broadcast %6 : vector<1x32xf32> to vector<8x32xf32>
    %8 = arith.addf %5, %7 : vector<8x32xf32>
    %c0_6 = arith.constant 0 : index
    %c0_7 = arith.constant 0 : index
    %9 = vector.load %arg2[%c0_6, %c0_7] : memref<8x32xf32, #tpu.memory_space<vmem>>, vector<8x32xf32>
    %10 = arith.addf %9, %8 : vector<8x32xf32>
    %c0_8 = arith.constant 0 : index
    %c0_9 = arith.constant 0 : index
    %11 = vector.load %arg7[%c0_8, %c0_9] : memref<8x32xf32, #tpu.memory_space<vmem>>, vector<8x32xf32>
    tpu.vector_store %arg7[%c0_8, %c0_9], %10 {strides = array<i32>} : memref<8x32xf32, #tpu.memory_space<vmem>>, vector<8x32xf32>,
    return
  }
  func.func @transform_0(%arg0: i32, %arg1: i32) -> (i32, i32) {
    %c0_i32 = arith.constant 0 : i32
    %c0_i32_0 = arith.constant 0 : i32
    return %arg0, %c0_i32 : i32, i32
  }
  func.func @transform_1(%arg0: i32, %arg1: i32) -> (i32, i32) {
    %c0_i32 = arith.constant 0 : i32
    %c0_i32_0 = arith.constant 0 : i32
    %c0_i32_1 = arith.constant 0 : i32
    return %c0_i32, %c0_i32_0 : i32, i32
  }
  func.func @transform_2(%arg0: i32, %arg1: i32) -> (i32, i32) {
    %c0_i32 = arith.constant 0 : i32
    %c0_i32_0 = arith.constant 0 : i32
    %c0_i32_1 = arith.constant 0 : i32
    return %c0_i32, %c0_i32_0 : i32, i32
  }
  func.func @transform_3(%arg0: i32, %arg1: i32) -> (i32, i32) {
    %c0_i32 = arith.constant 0 : i32
    %c0_i32_0 = arith.constant 0 : i32
    return %c0_i32, %arg1 : i32, i32
  }
  func.func @transform_4(%arg0: i32, %arg1: i32) -> (i32, i32) {
    %c0_i32 = arith.constant 0 : i32
    %c0_i32_0 = arith.constant 0 : i32
    return %c0_i32, %arg1 : i32, i32
  }
  func.func @transform_5(%arg0: i32, %arg1: i32) -> (i32, i32) {
    %c0_i32 = arith.constant 0 : i32
    return %arg0, %arg1 : i32, i32
  }
}

</mosaic_0001>

<bundles_post_ra>
// kernel: tpu_custom_call.1
= control target key start
LH: loop header
LB: loop body
LE: loop exit
PB: predicated region body
PF: predicated region fallthrough
CT: control target
= control target key end

     0   :  { %10 = vsyncpa [#allocation4], 0  ;;  %s1027_s0 = inlined_call_operand.hbm [shape: f32[16,32], index: 0, kind: input, shape index: {}]   ;;  %s1028_s1 = inlined_call_operand.hbm [shape: f32[1,32], index: 1, kind: input, shape index: {}]   ;;  %s1029_s2 = inlined_call_operand.vmem [shape: f32[1,32], index: 2, kind: input, shape index: {}]   ;;  %s1030_s3 = inlined_call_operand.hbm [shape: bf16[32,32], index: 3, kind: input, shape index: {}]   ;;  %s1031_s4 = inlined_call_operand.vmem [shape: f32[1,32], index: 4, kind: input, shape index: {}]   ;;  %s1032_s5 = inlined_call_operand.hbm [shape: f32[16,32], index: 5, kind: output, shape index: {}]  }
   0x1   :  { %12 = vsyncpa [#allocation4 + $0x1], 0 }
   0x2   :  { %13 = vsyncpa [#allocation7], 0 }
   0x3   :  { %14 = vsyncpa [#allocation5], 0 }
   0x4   :  { %16 = vsyncpa [#allocation5 + $0x1], 0  ;;  %s867_s18 = smov 0   ;;  %s869_s19 = smov 0  }
   0x5   :  { %s871_s20 = smov 0   ;;  %s873_s21 = smov 0  }
   0x6   :  { %s875_s22 = smov 0   ;;  %s877_s23 = smov 0  }
   0x7 LB: > { %s530_s24 = sadd.s32 4294967295, %s830_s23   ;;  %s531_s25 = sadd.s32 4294967294, %s830_s23   ;;  %s830_s23 = sphi %s877_s23, %s22_s23   ;;  %s826_s22 = sphi %s875_s22, %s1042_s22   ;;  %s822_s21 = sphi %s873_s21, %s1041_s21   ;;  %s818_s20 = sphi %s871_s20, %s1040_s20   ;;  %s814_s19 = sphi %s869_s19, %s1039_s19   ;;  %s810_s18 = sphi %s867_s18, %s1038_s18  }
   0x8   : > { %p54_p0 = scmp.ne.s32.totalorder %s814_s19, %s810_s18  ;;  %p903_p1 = scmp.eq.s32.totalorder %s530_s24, 0 }
   0x9   : > { %p180_p2 = scmp.eq.s32.totalorder %s531_s25, 1  ;;  %p532_p4 = scmp.ge.s32.totalorder %s830_s23, 1 }
   0xa   : > { %p909_p3 = por %p903_p1, %p54_p0  ;;  %p187_p6 = scmp.lt.s32.totalorder %s830_s23, 3 }
   0xb   : > { %p914_p5 = por %p180_p2, %p54_p0  ;;  %s199_s6 = sshll.u32 %s1028_s1, 4  ;;  %s200_s6 = int_to_ptr.hbm [resolvable:$true] %s199_s6 }
   0xc   : > { %p922_p7 = pnand %p532_p4, %p187_p6  ;;  %p536_p8 = scmp.ge.s32.totalorder %s830_s23, 2 }
   0xd   : > { %s832_s8 = smov [#allocation6]   ;;  %s215_s12 = sshll.u32 %s1030_s3, 4  ;;  %s216_s12 = int_to_ptr.hbm [resolvable:$true] %s215_s12 }
   0xe   : > { %p571_p9 = pneg %p922_p7  ;;  %s201_s9 = sshll.u32 %s832_s8, 4  ;;  %s202_s9 = int_to_ptr.vmem [resolvable:$true] %s201_s9 }
   0xf   : > { %s833_s13 = smov [#allocation8]   ;;  %s834_s15 = smov 64  }
  0x10   : > { %p572_p10 = pnand %p571_p9, %p903_p1  ;;  %s217_s14 = sshll.u32 %s833_s13, 4  ;;  %s218_s14 = int_to_ptr.vmem [resolvable:$true] %s217_s14 }
  0x11   : > { %s835_s16 = smov 4   ;;  %p174_p11 = scmp.eq.s32.totalorder %s530_s24, 1 }
  0x12   : > { %574 = dma.hbm_to_vmem [thread:$0]  (!%p572_p10), %s200_s6, 16, %s202_s9, [#allocation7]  }
  0x13   : > { %577 = dma.hbm_to_vmem [thread:$0]  (!%p572_p10), %s216_s12, 256, %s218_s14, [#allocation7], %s834_s15, %s834_s15, %s835_s16  }
  0x14   : > { %s34_s17 = sadd.s32 1, %s826_s22  ;;  %s41_s25 = sadd.s32 1, %s818_s20 }
  0x15   : > { %p36_p12 = scmp.ge.s32.totalorder %s34_s17, 2  ;;  %p48_p13 = scmp.ne.s32.totalorder %s818_s20, %s814_s19 }
  0x16   : > { %p49_p0 = scmp.eq.s32.totalorder %s830_s23, 0  ;;  %p588_p4 = scmp.lt.s32.totalorder %s830_s23, 2 }
  0x17   : > { %s1044_s17 = smov (%p36_p12, %s34_s17), 0  ;;  %p943_p2 = por %p174_p11, %p48_p13 }
  0x18   : > { %s38_s30 = ssub.s32 %s826_s22, %s1044_s17  ;;  %s237_s6 = sand.u32 1, %s818_s20  }
  0x19   : > { %p39_p6 = scmp.eq.s32.totalorder %s38_s30, 0  ;;  %p50_p9 = por %p49_p0, %p48_p13 }
  0x1a   : > { %s537_s8 = sshll.u32 %s237_s6, 3  ;;  %s538_s24 = sshll.u32 %s826_s22, 3 }
  0x1b   : > { %s953_s9 = scalar_select %p39_p6, %s818_s20, %s41_s25  }
  0x1c   : > { %s245_s12 = scalar_lea.hbm %s1027_s0, %s538_s24  ;;  %s241_s14 = scalar_lea.vmem [#allocation3], %s537_s8 }
  0x1d   : > { %s247_s13 = sshll.u32 %s245_s12, 4  ;;  %s249_s15 = sshll.u32 %s241_s14, 4  ;;  %s248_s13 = int_to_ptr.hbm [resolvable:$true] %s247_s13  ;;  %s250_s15 = int_to_ptr.vmem [resolvable:$true] %s249_s15 }
  0x1e   : > { %p579_p10 = pnand %p588_p4, %p50_p9  ;;  %s238_s16 = scalar_lea.sflag [#allocation4], %s237_s6 }
  0x1f   : > { %258 = sbr.rel (%p922_p7) target bundleno = 462 (0x1ce), region = 40  ;;  %s963_s25 = sand.u32 (!%p922_p7), 1, %s814_s19  }
  0x20   : > { %581 = dma.hbm_to_vmem [thread:$0]  (!%p579_p10), %s248_s13, 128, %s250_s15, %s238_s16  }
  0x21   : > { %s540_s30 = sshll.u32 (!%p922_p7), %s963_s25, 3  ;;  %s261_s24 = scalar_lea.sflag (!%p922_p7), [#allocation4], %s963_s25 }
  0x22   : > { %s264_s8 = scalar_lea.vmem (!%p922_p7), [#allocation3], %s540_s30 }
  0x24   : > { %797 = dma.done.wait (%p909_p3), %s261_s24, 128  }
  0x25   : > { %799 = vsyncadd (%p909_p3), %s261_s24, 4294967168 }
  0x26   : > { %801 = dma.done.wait (%p903_p1), [#allocation7], 272  }
  0x27   : > { %803 = vsyncadd (%p903_p1), [#allocation7], 4294967024  ;;  %vm316_vm0 = vcmask 261120   ;;  %v315_v0 = vld [vmem:[%s264_s8] sm:$0xff]  ;;  %v836_v2 = vmov 32.0   ;;  %v557_v17 = vld [vmem:[#allocation8] sm:$0xff] }
  0x28   : > { %v317_v1 = vsel %vm316_vm0, %v315_v0, 0.0  ;;  %648 = vrcp.f32 %v836_v2  ;;  %v558_v16 = vld [vmem:[#allocation8 + $0x8] sm:$0xff]  ;;  %v645_v29 = vld [vmem:[#allocation6] ss:$0 sm:$0xff]  ;;  %vm358_vm4 = vcmask 257024   ;;  %s554_s7 = sshll.u32 %s822_s21, 3 }
  0x29   : > { %318 = vadd.xlane.f32.xlu0 %v317_v1  ;;  %391 = vmatpush.bf16.msra.mxu0 %v558_v16  ;;  %v646_v32 = vld [vmem:[%s1029_s2] ss:$0 sm:$0xff]  ;;  %s413_s13 = scalar_lea.hbm %s1032_s5, %s554_s7  ;;  %s304_s14 = scalar_lea.vmem [#allocation9], %s540_s30 }
  0x2a   : > { %v647_v37 = vld [vmem:[%s1031_s4] ss:$0 sm:$0xff]  ;;  %s415_s15 = sshll.u32 %s304_s14, 4  ;;  %s417_s16 = sshll.u32 %s413_s13, 4  ;;  %s416_s15 = int_to_ptr.vmem [resolvable:$true] %s415_s15  ;;  %s418_s16 = int_to_ptr.hbm [resolvable:$true] %s417_s16 }
  0x2b   : > { %s402_s21 = scalar_lea.sflag [#allocation5], %s963_s25  ;;  %s758_s24 = sshra.s32 %s418_s16, 4  ;;  %s759_s24 = int_to_ptr.hbm [resolvable:$true] %s758_s24 }
  0x2c   : > { %s760_s8 = scalar_lea.hbm %s759_s24, 8  ;;  %s764_s30 = scalar_lea.hbm %s1032_s5, 16 }
  0x2d   : > { %392 = vmatpush.bf16.msra.mxu0 %v557_v17  ;;  %p761_p1 = scmp.ne.s32.totalorder %s759_s24, %s760_s8  ;;  %p765_p11 = scmp.lt.s32.totalorder %s759_s24, %s1032_s5 }
  0x2e   : > { %v649_v3 = vpop.eup %648  ;;  %p766_p12 = scmp.lt.s32.totalorder %s764_s30, %s760_s8 }
  0x2f   : > { %v321_v4 = vmul.f32 32.0, %v649_v3  ;;  %vm325_vm1 = vweird.f32 %v649_v3  ;;  %p762_p3 = pnand %p761_p1, %p943_p2 }
  0x30   : > { %p767_p13 = por %p766_p12, %p765_p11 }
  0x31   : > { %v322_v5 = vsub.f32 1.0, %v321_v4  ;;  %p763_p7 = pneg %p762_p3 }
  0x33   : > { %v323_v6 = vmul.f32 %v649_v3, %v322_v5  ;;  %p768_p0 = pnand %p767_p13, %p763_p7 }
  0x35   : > { %v324_v7 = vadd.f32 %v649_v3, %v323_v6 }
  0x37   : > { %v326_v8 = vsel %vm325_vm1, %v649_v3, %v324_v7 }
  0x9c   : > { %v319_v9 = vpop.xlane.xlu0 %318 }
  0x9d   : > { %v327_v10 = vmul.f32 %v326_v8, %v319_v9 }
  0x9f   : > { %v328_v11 = vsub.f32 %v315_v0, %v327_v10 }
  0xa1   : > { %v329_v12 = vmul.f32 %v328_v11, %v328_v11 }
  0xa3   : > { %v330_v13 = vsel %vm316_vm0, %v329_v12, 0.0 }
  0xa4   : > { %331 = vadd.xlane.f32.xlu0 %v330_v13 }
 0x117   : > { %v332_v14 = vpop.xlane.xlu0 %331 }
 0x118   : > { %v333_v15 = vmul.f32 0.032258064, %v332_v14 }
 0x11a   : > { %650 = vrsqrt.f32 %v333_v15  ;;  %vm341_vm2 = vcmp.eq.f32.partialorder %v333_v15, inf  ;;  %v344_v25 = vand.u32 2147483648, %v333_v15  ;;  %vm343_vm3 = vcmp.eq.f32.partialorder %v333_v15, 0.0 }
 0x120   : > { %v651_v18 = vpop.eup %650 }
 0x121   : > { %v335_v19 = vmul.f32 %v651_v18, %v333_v15 }
 0x123   : > { %v336_v20 = vmul.f32 %v651_v18, %v335_v19 }
 0x125   : > { %v337_v21 = vmul.f32 0.5, %v336_v20 }
 0x127   : > { %v338_v22 = vsub.f32 1.5, %v337_v21 }
 0x129   : > { %v339_v23 = vmul.f32 %v651_v18, %v338_v22 }
 0x12b   : > { %v340_v24 = vmul.f32 %v339_v23, %v333_v15 }
 0x12d   : > { %v342_v26 = vsel %vm341_vm2, %v333_v15, %v340_v24 }
 0x12e   : > { %v345_v27 = vsel %vm343_vm3, %v344_v25, %v342_v26 }
 0x12f   : > { %v346_v28 = vadd.f32 1e-06, %v345_v27 }
 0x131   : > { %652 = vrcp.f32 %v346_v28 }
 0x137   : > { %v653_v30 = vpop.eup %652 }
 0x138   : > { %v348_v31 = vmul.f32 %v653_v30, %v328_v11 }
 0x13a   : > { %v352_v33 = vmul.f32 %v645_v29, %v348_v31 }
 0x13c   : > { %v356_v34 = vadd.f32 %v646_v32, %v352_v33 }
 0x13e   : > { %v357_v35 = vpack.c.bf16 %v356_v34, %v356_v34 }
 0x140   : > { %359 = vst.msk [vmem:[#allocation2] sm:$0xf] %vm358_vm4, %v357_v35 }
 0x147   : > { %v360_v36 = vld [vmem:[#allocation2] sm:$0xf] }
 0x148   : > { %552 = vmatmul.msk.bf16.vlgmr.msra.gmra.mxu0 %vm316_vm0, %v360_v36 }
 0x1c5   : > { %v394_v38 = vpop.f32.mrf.mxu0 }
 0x1c6   : > { %v395_v39 = vadd.f32 %v647_v37, %v394_v38 }
 0x1c8   : > { %v399_v40 = vadd.f32 %v395_v39, %v315_v0 }
 0x1ca   : > { %400 = vst.msk [vmem:[%s304_s14] sm:$0xff] %vm316_vm0, %v399_v40 }
 0x1cb   : > { %771 = shalt.err (!%p768_p0)
}
 0x1cc   : > { %569 = dma.vmem_to_hbm [thread:$0]  (%p943_p2), %s416_s15, 128, %s418_s16, %s402_s21  }
 0x1cd   : > { %v396_v41 = vpop.f32.mrf.mxu0 }
 0x1ce PF: > { %s429_s25 = sand.u32 1, %s810_s18   ;;  %p583_p4 = pnand %p536_p8, %p914_p5 }
 0x1cf   : > { %s430_s10 = scalar_lea.sflag [#allocation5], %s429_s25 }
 0x1d0   : > { %p584_p6 = pneg %p583_p4 }
 0x1d2   : > { %805 = dma.done.wait (%p584_p6), %s430_s10, 128  }
 0x1d3   : > { %807 = vsyncadd (%p584_p6), %s430_s10, 4294967168  ;;  %s22_s23 = sadd.s32 1, %s830_s23   ;;  %s1038_s18 = smov %s814_s19 }
 0x1d4   : > { %p19_p9 = scmp.ge.s32.totalorder %s22_s23, 4   ;;  %s1039_s19 = smov %s818_s20 }
 0x1d5   : > { %s1040_s20 = smov %s953_s9  ;;  %s1041_s21 = smov %s826_s22 }
 0x1d6   : > { %s1042_s22 = smov %s1044_s17  ;;  %21 = sbr.rel (!%p19_p9) target bundleno = 7 (0x7), region = 101 }
 0x1db   :  { %436 = vsyncpa [#allocation4], 1 }
 0x1dc   :  { %438 = vsyncpa [#allocation4 + $0x1], 1 }
 0x1dd   :  { %439 = vsyncpa [#allocation7], 1 }
 0x1de   :  { %440 = vsyncpa [#allocation5], 1 }
 0x1df   :  { %442 = vsyncpa [#allocation5 + $0x1], 1 }

</bundles_post_ra>
